<compile_context>
chip_gen: v5e
topology: v5e:2x2
jax: 0.10.0
libtpu: 0.0.40
codegen_flags: <defaults>
</compile_context>

<pallas_src>
import jax
import jax.numpy as jnp
from jax.experimental import pallas as pl
from jax.experimental.pallas import tpu as pltpu

_LN_EPS = 1e-5


# --------------------------------------------------------------------------
# Shared cell math (operates on values, not refs).
# --------------------------------------------------------------------------
def _cell_math(x, h, w_in, b_in, w_h, recip_tau, gamma, beta, hidden_size):
    """One ODE-cell evaluation: bf16 MXU matmuls, f32 accumulate + epilogue."""
    input_term = jnp.dot(x.astype(w_in.dtype), w_in,
                         preferred_element_type=jnp.float32) + b_in       # (TB, H)
    hz = jnp.dot(h.astype(w_h.dtype), w_h,
                 preferred_element_type=jnp.float32)                      # (TB, 2H)
    gate_pre = hz[:, :hidden_size]
    rec_pre = hz[:, hidden_size:]
    recurrent_term = jax.nn.sigmoid(gate_pre) * jnp.tanh(rec_pre)

    dhdt = (-h + recurrent_term + input_term) * recip_tau                 # (TB, H)

    mean = jnp.mean(dhdt, axis=-1, keepdims=True)
    centered = dhdt - mean
    var = jnp.mean(centered * centered, axis=-1, keepdims=True)
    normed = centered * jax.lax.rsqrt(var + _LN_EPS)                      # exact rsqrt
    return normed * gamma + beta


# --------------------------------------------------------------------------
# Single-step kernel: exactly the module's forward(t, h).
# --------------------------------------------------------------------------
def ode_step_kernel(x_ref, h_ref, w_in_ref, b_in_ref, w_h_ref,
                    log_tau_ref, gamma_ref, beta_ref, out_ref):
    hidden = h_ref.shape[-1]
    # tau reciprocal computed once on the (1, H) row (EUP), broadcast over batch.
    tau = jax.nn.softplus(log_tau_ref[...]) + 0.1
    recip_tau = pl.reciprocal(tau, approx=True)

    out = _cell_math(x_ref[...], h_ref[...].astype(jnp.float32),
                     w_in_ref[...], b_in_ref[...], w_h_ref[...],
                     recip_tau, gamma_ref[...], beta_ref[...], hidden)
    out_ref[...] = out.astype(out_ref.dtype)


def _batch_tile(batch):
    if batch <= 128:
        return batch
    for tb in (256, 128):
        if batch % tb == 0:
            return tb
    return batch  # fall back to a single whole-batch block


def ode_forward(x, h, packed):
    """Single ODE-cell step. Batch grid ("parallel"), weights pinned in VMEM."""
    B, H = h.shape
    D = x.shape[-1]
    tb = _batch_tile(B)
    grid = (B // tb,)
    const = lambda i: (0, 0)
    return pl.pallas_call(
        ode_step_kernel,
        out_shape=jax.ShapeDtypeStruct((B, H), jnp.float32),
        grid=grid,
        in_specs=[
            pl.BlockSpec((tb, D), lambda i: (i, 0)),   # x
            pl.BlockSpec((tb, H), lambda i: (i, 0)),   # h
            pl.BlockSpec((D, H), const),               # w_in   (bf16)
            pl.BlockSpec((1, H), const),               # b_in
            pl.BlockSpec((H, 2 * H), const),           # w_h = [w_gate | w_rec] (bf16)
            pl.BlockSpec((1, H), const),               # log_tau
            pl.BlockSpec((1, H), const),               # gamma
            pl.BlockSpec((1, H), const),               # beta
        ],
        out_specs=pl.BlockSpec((tb, H), lambda i: (i, 0)),
        compiler_params=pltpu.CompilerParams(
            dimension_semantics=("parallel",)),
    )(x, h, packed["w_in"], packed["b_in"], packed["w_h"],
      packed["log_tau"], packed["gamma"], packed["beta"])


# --------------------------------------------------------------------------
# Fused multi-step kernel: time loop inside one pallas_call.
# Weights + h stay resident in VMEM; recip_tau hoisted to step 0.
# --------------------------------------------------------------------------
def make_ode_integrate_kernel(dt, hidden_size):
    def kernel(x_ref, h0_ref, w_in_ref, b_in_ref, w_h_ref,
               log_tau_ref, gamma_ref, beta_ref,
               out_ref, h_final_ref, h_scr, rtau_scr):
        t = pl.program_id(0)

        @pl.when(t == 0)
        def _init():
            h_scr[...] = h0_ref[...].astype(jnp.float32)
            tau = jax.nn.softplus(log_tau_ref[...]) + 0.1
            rtau_scr[...] = pl.reciprocal(tau, approx=True)

        h = h_scr[...]
        out = _cell_math(x_ref[0], h, w_in_ref[...], b_in_ref[...],
                         w_h_ref[...], rtau_scr[...], gamma_ref[...],
                         beta_ref[...], hidden_size)
        out_ref[0] = out.astype(out_ref.dtype)

        # TODO(synk): the explicit-Euler update is the integration driver, not
        # part of the nn.Module (the module only defines dh/dt = forward(t, h)).
        h_scr[...] = h + dt * out

        @pl.when(t == pl.num_programs(0) - 1)
        def _final():
            h_final_ref[...] = h_scr[...].astype(h_final_ref.dtype)

    return kernel


def ode_integrate(x_seq, h0, packed, dt):
    """T Euler steps of the ODE cell fused into one kernel (grid over time)."""
    T, B, D = x_seq.shape
    H = h0.shape[-1]
    const = lambda t: (0, 0)
    kernel = make_ode_integrate_kernel(float(dt), H)
    return pl.pallas_call(
        kernel,
        out_shape=(jax.ShapeDtypeStruct((T, B, H), jnp.float32),
                   jax.ShapeDtypeStruct((B, H), jnp.float32)),
        grid=(T,),
        in_specs=[
            pl.BlockSpec((1, B, D), lambda t: (t, 0, 0)),  # x_seq, one step/iter
            pl.BlockSpec((B, H), const),                   # h0
            pl.BlockSpec((D, H), const),                   # w_in   (bf16)
            pl.BlockSpec((1, H), const),                   # b_in
            pl.BlockSpec((H, 2 * H), const),               # w_h    (bf16)
            pl.BlockSpec((1, H), const),                   # log_tau
            pl.BlockSpec((1, H), const),                   # gamma
            pl.BlockSpec((1, H), const),                   # beta
        ],
        out_specs=(pl.BlockSpec((1, B, H), lambda t: (t, 0, 0)),
                   pl.BlockSpec((B, H), const)),
        scratch_shapes=[pltpu.VMEM((B, H), jnp.float32),   # resident hidden state
                        pltpu.VMEM((1, H), jnp.float32)],  # hoisted recip_tau
        compiler_params=pltpu.CompilerParams(
            dimension_semantics=("arbitrary",)),
    )(x_seq, h0, packed["w_in"], packed["b_in"], packed["w_h"],
      packed["log_tau"], packed["gamma"], packed["beta"])


# --------------------------------------------------------------------------
# Pure-JAX references.
# --------------------------------------------------------------------------
def ode_forward_ref(x, h, params):
    """f32 reference mirroring the PyTorch module exactly."""
    tau = jax.nn.softplus(params["log_tau"]) + 0.1
    input_term = x @ params["w_in"] + params["b_in"]
    recurrent_term = jax.nn.sigmoid(h @ params["w_gate"]) * jnp.tanh(h @ params["w_rec"])
    dhdt = (-h + recurrent_term + input_term) / tau
    mean = jnp.mean(dhdt, axis=-1, keepdims=True)
    var = jnp.mean((dhdt - mean) ** 2, axis=-1, keepdims=True)
    normed = (dhdt - mean) * jax.lax.rsqrt(var + _LN_EPS)
    return normed * params["gamma"] + params["beta"]


def ode_forward_ref_mxu(x, h, packed):
    """Reference matching the kernel's numerics (bf16 matmuls, concat weight)."""
    H = h.shape[-1]
    w_in, w_h = packed["w_in"], packed["w_h"]
    input_term = jnp.dot(x.astype(w_in.dtype), w_in,
                         preferred_element_type=jnp.float32) + packed["b_in"]
    hz = jnp.dot(h.astype(w_h.dtype), w_h, preferred_element_type=jnp.float32)
    rec = jax.nn.sigmoid(hz[:, :H]) * jnp.tanh(hz[:, H:])
    tau = jax.nn.softplus(packed["log_tau"]) + 0.1
    dhdt = (-h + rec + input_term) / tau
    mean = jnp.mean(dhdt, axis=-1, keepdims=True)
    var = jnp.mean((dhdt - mean) ** 2, axis=-1, keepdims=True)
    normed = (dhdt - mean) * jax.lax.rsqrt(var + _LN_EPS)
    return normed * packed["gamma"] + packed["beta"]


def ode_integrate_ref(x_seq, h0, packed, dt):
    h = h0
    outs = []
    for t in range(x_seq.shape[0]):
        o = ode_forward_ref_mxu(x_seq[t], h, packed)
        outs.append(o)
        h = h + dt * o
    return jnp.stack(outs, axis=0), h


# --------------------------------------------------------------------------
# Parameter construction.
# --------------------------------------------------------------------------
def make_params(key, input_size, hidden_size):
    """f32 "module" parameters; linear weights already stored transposed."""
    ks = jax.random.split(key, 5)
    scale_in = 1.0 / jnp.sqrt(input_size)
    scale_h = 1.0 / jnp.sqrt(hidden_size)
    return {
        "w_in": jax.random.uniform(ks[0], (input_size, hidden_size),
                                   jnp.float32, -scale_in, scale_in),
        "b_in": jax.random.uniform(ks[1], (1, hidden_size),
                                   jnp.float32, -scale_in, scale_in),
        "w_rec": jax.random.uniform(ks[2], (hidden_size, hidden_size),
                                    jnp.float32, -scale_h, scale_h),
        "w_gate": jax.random.uniform(ks[3], (hidden_size, hidden_size),
                                     jnp.float32, -scale_h, scale_h),
        "log_tau": jax.random.normal(ks[4], (1, hidden_size), jnp.float32),
        "gamma": jnp.ones((1, hidden_size), jnp.float32),
        "beta": jnp.zeros((1, hidden_size), jnp.float32),
    }


def pack_params(params, weight_dtype=jnp.bfloat16):
    """Kernel layout: bf16 weights, gate|rec concatenated along the output dim."""
    return {
        "w_in": params["w_in"].astype(weight_dtype),
        "w_h": jnp.concatenate([params["w_gate"], params["w_rec"]],
                               axis=1).astype(weight_dtype),
        "b_in": params["b_in"],
        "log_tau": params["log_tau"],
        "gamma": params["gamma"],
        "beta": params["beta"],
    }


# --------------------------------------------------------------------------
# Demo / correctness check.
# --------------------------------------------------------------------------
if __name__ == "__main__":
    B, D_IN, H = 8, 16, 32
    T, DT = 6, 0.05

    key = jax.random.PRNGKey(0)
    k_x, k_h, k_p = jax.random.split(key, 3)

    params = make_params(k_p, D_IN, H)   # f32 module parameters
    packed = pack_params(params)         # kernel-facing bf16 / concatenated layout

    # TODO(synk): the PyTorch module fetches x via set_input(input_func) and calls
    # self._current_input(t); here input_func(t) is evaluated in plain JAX (glue)
    # and the resulting arrays are fed to the kernels directly.
    base_x = jax.random.normal(k_x, (B, D_IN), jnp.float32)
    h0 = jax.random.normal(k_h, (B, H), jnp.float32)
    ts = DT * jnp.arange(T, dtype=jnp.float32)
    x_seq = base_x[None] * jnp.sin(ts)[:, None, None]          # x_t = input_func(t)

    # --- single step: exactly the module's forward(t, h) ---------------------
    x = base_x * jnp.sin(jnp.float32(0.5))
    out = jax.block_until_ready(ode_forward(x, h0, packed))
    ref_mxu = ode_forward_ref_mxu(x, h0, packed)
    ref_f32 = ode_forward_ref(x, h0, params)
    assert out.shape == (B, H)
    assert jnp.allclose(out, ref_mxu, atol=1e-2, rtol=1e-2), \
        "single-step kernel mismatch vs matched (bf16) reference"
    assert jnp.allclose(out, ref_f32, atol=1e-1, rtol=1e-1), \
        "single-step kernel mismatch vs f32 module reference"

    # --- fused multi-step integration (weights & h stay VMEM-resident) -------
    out_seq, h_final = jax.block_until_ready(ode_integrate(x_seq, h0, packed, DT))
    ref_seq, ref_h = ode_integrate_ref(x_seq, h0, packed, DT)
    assert out_seq.shape == (T, B, H) and h_final.shape == (B, H)
    assert jnp.allclose(out_seq, ref_seq, atol=2e-2, rtol=2e-2), \
        "fused kernel trajectory mismatch"
    assert jnp.allclose(h_final, ref_h, atol=2e-2, rtol=2e-2), \
        "fused kernel final-state mismatch"

    print("KERNEL_OK")
</pallas_src>

<mosaic_0001>
module attributes {stable_mosaic.version = 11 : i64} {
  func.func @ode_step_kernel(%arg0: i32, %arg1: memref<8x16xf32, #tpu.memory_space<vmem>>, %arg2: memref<8x32xf32, #tpu.memory_space<vmem>>, %arg3: memref<16x32xbf16, #tpu.memory_space<vmem>>, %arg4: memref<1x32xf32, #tpu.memory_space<vmem>>, %arg5: memref<32x64xbf16, #tpu.memory_space<vmem>>, %arg6: memref<1x32xf32, #tpu.memory_space<vmem>>, %arg7: memref<1x32xf32, #tpu.memory_space<vmem>>, %arg8: memref<1x32xf32, #tpu.memory_space<vmem>>, %arg9: memref<8x32xf32, #tpu.memory_space<vmem>>) attributes {dimension_semantics = [#tpu.dimension_semantics<parallel>], iteration_bounds = array<i64: 1>, scalar_prefetch = 0 : i64, scratch_operands = 0 : i64, tpu.core_type = #tpu.core_type<tc>, window_params = [{transform_indices = @transform_0, window_bounds = array<i64: 8, 16>}, {transform_indices = @transform_1, window_bounds = array<i64: 8, 32>}, {pipeline_mode = #tpu.pipeline_mode<synchronous>, transform_indices = @transform_2, window_bounds = array<i64: 16, 32>}, {pipeline_mode = #tpu.pipeline_mode<synchronous>, transform_indices = @transform_3, window_bounds = array<i64: 1, 32>}, {pipeline_mode = #tpu.pipeline_mode<synchronous>, transform_indices = @transform_4, window_bounds = array<i64: 32, 64>}, {pipeline_mode = #tpu.pipeline_mode<synchronous>, transform_indices = @transform_5, window_bounds = array<i64: 1, 32>}, {pipeline_mode = #tpu.pipeline_mode<synchronous>, transform_indices = @transform_6, window_bounds = array<i64: 1, 32>}, {pipeline_mode = #tpu.pipeline_mode<synchronous>, transform_indices = @transform_7, window_bounds = array<i64: 1, 32>}, {transform_indices = @transform_8, window_bounds = array<i64: 8, 32>}]} {
    %c0 = arith.constant 0 : index
    %c0_0 = arith.constant 0 : index
    %0 = vector.load %arg6[%c0, %c0_0] : memref<1x32xf32, #tpu.memory_space<vmem>>, vector<1x32xf32>
    %cst = arith.constant 0.000000e+00 : f32
    %1 = vector.broadcast %cst : f32 to vector<1x32xf32>
    %2 = arith.maximumf %0, %1 : vector<1x32xf32>
    %3 = vector.broadcast %cst : f32 to vector<1x32xf32>
    %4 = arith.subf %0, %3 : vector<1x32xf32>
    %5 = arith.cmpf one, %4, %4 : vector<1x32xf32>
    %6 = vector.broadcast %cst : f32 to vector<1x32xf32>
    %7 = arith.addf %0, %6 : vector<1x32xf32>
    %8 = math.absf %4 : vector<1x32xf32>
    %cst_1 = arith.constant 0.000000e+00 : f32
    %9 = vector.broadcast %cst_1 : f32 to vector<1x32xf32>
    %10 = arith.subf %9, %8 : vector<1x32xf32>
    %11 = math.exp %10 : vector<1x32xf32>
    %12 = math.log1p %11 : vector<1x32xf32>
    %13 = arith.addf %2, %12 : vector<1x32xf32>
    %14 = arith.select %5, %7, %13 : vector<1x32xi1>, vector<1x32xf32>
    %cst_2 = arith.constant 1.000000e-01 : f32
    %15 = vector.broadcast %cst_2 : f32 to vector<1x32xf32>
    %16 = arith.addf %14, %15 : vector<1x32xf32>
    %17 = tpu.reciprocal %16 {approx = true} : vector<1x32xf32> -> vector<1x32xf32>
    %c0_3 = arith.constant 0 : index
    %c0_4 = arith.constant 0 : index
    %18 = vector.load %arg1[%c0_3, %c0_4] : memref<8x16xf32, #tpu.memory_space<vmem>>, vector<8x16xf32>
    %c0_5 = arith.constant 0 : index
    %c0_6 = arith.constant 0 : index
    %19 = vector.load %arg2[%c0_5, %c0_6] : memref<8x32xf32, #tpu.memory_space<vmem>>, vector<8x32xf32>
    %c0_7 = arith.constant 0 : index
    %c0_8 = arith.constant 0 : index
    %20 = vector.load %arg3[%c0_7, %c0_8] : memref<16x32xbf16, #tpu.memory_space<vmem>>, vector<16x32xbf16>
    %c0_9 = arith.constant 0 : index
    %c0_10 = arith.constant 0 : index
    %21 = vector.load %arg4[%c0_9, %c0_10] : memref<1x32xf32, #tpu.memory_space<vmem>>, vector<1x32xf32>
    %c0_11 = arith.constant 0 : index
    %c0_12 = arith.constant 0 : index
    %22 = vector.load %arg5[%c0_11, %c0_12] : memref<32x64xbf16, #tpu.memory_space<vmem>>, vector<32x64xbf16>
    %c0_13 = arith.constant 0 : index
    %c0_14 = arith.constant 0 : index
    %23 = vector.load %arg7[%c0_13, %c0_14] : memref<1x32xf32, #tpu.memory_space<vmem>>, vector<1x32xf32>
    %c0_15 = arith.constant 0 : index
    %c0_16 = arith.constant 0 : index
    %24 = vector.load %arg8[%c0_15, %c0_16] : memref<1x32xf32, #tpu.memory_space<vmem>>, vector<1x32xf32>
    %25 = arith.truncf %18 : vector<8x16xf32> to vector<8x16xbf16>
    %cst_17 = arith.constant dense<0.000000e+00> : vector<8x32xf32>
    %26 = tpu.matmul %25, %20, %cst_17 {dimension_numbers = #tpu.dot_dimension_numbers<[1], [0], [0], [1], [0, 0, 1, 1], [], []>} : vector<8x16xbf16>, vector<16x32xbf16>, vector<8x32xf32> -> vector<8x32xf32>
    %27 = vector.broadcast %21 : vector<1x32xf32> to vector<8x32xf32>
    %28 = arith.addf %26, %27 : vector<8x32xf32>
    %29 = arith.truncf %19 : vector<8x32xf32> to vector<8x32xbf16>
    %cst_18 = arith.constant dense<0.000000e+00> : vector<8x64xf32>
    %30 = tpu.matmul %29, %22, %cst_18 {dimension_numbers = #tpu.dot_dimension_numbers<[1], [0], [0], [1], [0, 0, 1, 1], [], []>} : vector<8x32xbf16>, vector<32x64xbf16>, vector<8x64xf32> -> vector<8x64xf32>
    %31 = vector.extract_strided_slice %30 {offsets = [0, 0], sizes = [8, 32], strides = [1, 1]} : vector<8x64xf32> to vector<8x32xf32>
    %32 = vector.extract_strided_slice %30 {offsets = [0, 32], sizes = [8, 32], strides = [1, 1]} : vector<8x64xf32> to vector<8x32xf32>
    %33 = arith.negf %31 : vector<8x32xf32>
    %34 = math.exp %33 : vector<8x32xf32>
    %cst_19 = arith.constant 1.000000e+00 : f32
    %35 = vector.broadcast %cst_19 : f32 to vector<8x32xf32>
    %36 = arith.addf %35, %34 : vector<8x32xf32>
    %37 = arith.divf %35, %36 : vector<8x32xf32>
    %38 = math.tanh %32 : vector<8x32xf32>
    %39 = arith.mulf %37, %38 : vector<8x32xf32>
    %cst_20 = arith.constant 0.000000e+00 : f32
    %40 = vector.broadcast %cst_20 : f32 to vector<8x32xf32>
    %41 = arith.subf %40, %19 : vector<8x32xf32>
    %42 = arith.addf %41, %39 : vector<8x32xf32>
    %43 = arith.addf %42, %28 : vector<8x32xf32>
    %44 = vector.broadcast %17 : vector<1x32xf32> to vector<8x32xf32>
    %45 = arith.mulf %43, %44 : vector<8x32xf32>
    %cst_21 = arith.constant dense<0.000000e+00> : vector<8xf32>
    %46 = vector.multi_reduction <add>, %45, %cst_21 [1] : vector<8x32xf32> to vector<8xf32>
    %47 = vector.shape_cast %46 : vector<8xf32> to vector<8x1xf32>
    %cst_22 = arith.constant 3.200000e+01 : f32
    %48 = vector.broadcast %cst_22 : f32 to vector<8x1xf32>
    %49 = arith.divf %47, %48 : vector<8x1xf32>
    %50 = vector.broadcast %49 : vector<8x1xf32> to vector<8x32xf32>
    %51 = arith.subf %45, %50 : vector<8x32xf32>
    %52 = arith.mulf %51, %51 : vector<8x32xf32>
    %cst_23 = arith.constant dense<0.000000e+00> : vector<8xf32>
    %53 = vector.multi_reduction <add>, %52, %cst_23 [1] : vector<8x32xf32> to vector<8xf32>
    %54 = vector.shape_cast %53 : vector<8xf32> to vector<8x1xf32>
    %cst_24 = arith.constant 3.200000e+01 : f32
    %55 = vector.broadcast %cst_24 : f32 to vector<8x1xf32>
    %56 = arith.divf %54, %55 : vector<8x1xf32>
    %cst_25 = arith.constant 9.99999974E-6 : f32
    %57 = vector.broadcast %cst_25 : f32 to vector<8x1xf32>
    %58 = arith.addf %56, %57 : vector<8x1xf32>
    %59 = math.rsqrt %58 : vector<8x1xf32>
    %60 = vector.broadcast %59 : vector<8x1xf32> to vector<8x32xf32>
    %61 = arith.mulf %51, %60 : vector<8x32xf32>
    %62 = vector.broadcast %23 : vector<1x32xf32> to vector<8x32xf32>
    %63 = arith.mulf %61, %62 : vector<8x32xf32>
    %64 = vector.broadcast %24 : vector<1x32xf32> to vector<8x32xf32>
    %65 = arith.addf %63, %64 : vector<8x32xf32>
    %c0_26 = arith.constant 0 : index
    %c0_27 = arith.constant 0 : index
    %66 = vector.load %arg9[%c0_26, %c0_27] : memref<8x32xf32, #tpu.memory_space<vmem>>, vector<8x32xf32>
    tpu.vector_store %arg9[%c0_26, %c0_27], %65 {strides = array<i32>} : memref<8x32xf32, #tpu.memory_space<vmem>>, vector<8x32xf32>,
    return
  }
  func.func @transform_0(%arg0: i32) -> (i32, i32) {
    %c0_i32 = arith.constant 0 : i32
    %c0_i32_0 = arith.constant 0 : i32
    return %arg0, %c0_i32 : i32, i32
  }
  func.func @transform_1(%arg0: i32) -> (i32, i32) {
    %c0_i32 = arith.constant 0 : i32
    %c0_i32_0 = arith.constant 0 : i32
    return %arg0, %c0_i32 : i32, i32
  }
  func.func @transform_2(%arg0: i32) -> (i32, i32) {
    %c0_i32 = arith.constant 0 : i32
    %c0_i32_0 = arith.constant 0 : i32
    %c0_i32_1 = arith.constant 0 : i32
    return %c0_i32, %c0_i32_0 : i32, i32
  }
  func.func @transform_3(%arg0: i32) -> (i32, i32) {
    %c0_i32 = arith.constant 0 : i32
    %c0_i32_0 = arith.constant 0 : i32
    %c0_i32_1 = arith.constant 0 : i32
    return %c0_i32, %c0_i32_0 : i32, i32
  }
  func.func @transform_4(%arg0: i32) -> (i32, i32) {
    %c0_i32 = arith.constant 0 : i32
    %c0_i32_0 = arith.constant 0 : i32
    %c0_i32_1 = arith.constant 0 : i32
    return %c0_i32, %c0_i32_0 : i32, i32
  }
  func.func @transform_5(%arg0: i32) -> (i32, i32) {
    %c0_i32 = arith.constant 0 : i32
    %c0_i32_0 = arith.constant 0 : i32
    %c0_i32_1 = arith.constant 0 : i32
    return %c0_i32, %c0_i32_0 : i32, i32
  }
  func.func @transform_6(%arg0: i32) -> (i32, i32) {
    %c0_i32 = arith.constant 0 : i32
    %c0_i32_0 = arith.constant 0 : i32
    %c0_i32_1 = arith.constant 0 : i32
    return %c0_i32, %c0_i32_0 : i32, i32
  }
  func.func @transform_7(%arg0: i32) -> (i32, i32) {
    %c0_i32 = arith.constant 0 : i32
    %c0_i32_0 = arith.constant 0 : i32
    %c0_i32_1 = arith.constant 0 : i32
    return %c0_i32, %c0_i32_0 : i32, i32
  }
  func.func @transform_8(%arg0: i32) -> (i32, i32) {
    %c0_i32 = arith.constant 0 : i32
    %c0_i32_0 = arith.constant 0 : i32
    return %arg0, %c0_i32 : i32, i32
  }
}

</mosaic_0001>

<bundles_post_ra>
// kernel: tpu_custom_call.1
= control target key start
LH: loop header
LB: loop body
LE: loop exit
PB: predicated region body
PF: predicated region fallthrough
CT: control target
= control target key end

     0   :  { %13 = vsyncpa [#allocation3], 0  ;;  %s532_s0 = inlined_call_operand.hbm [shape: f32[8,16], index: 0, kind: input, shape index: {}]   ;;  %s533_s1 = inlined_call_operand.hbm [shape: f32[8,32], index: 1, kind: input, shape index: {}]   ;;  %s534_s2 = inlined_call_operand.hbm [shape: bf16[16,32], index: 2, kind: input, shape index: {}]   ;;  %s535_s3 = inlined_call_operand.vmem [shape: f32[1,32], index: 3, kind: input, shape index: {}]   ;;  %s536_s4 = inlined_call_operand.hbm [shape: bf16[32,64], index: 4, kind: input, shape index: {}]   ;;  %s537_s5 = inlined_call_operand.vmem [shape: f32[1,32], index: 5, kind: input, shape index: {}]   ;;  %s538_s6 = inlined_call_operand.vmem [shape: f32[1,32], index: 6, kind: input, shape index: {}]   ;;  %s539_s7 = inlined_call_operand.vmem [shape: f32[1,32], index: 7, kind: input, shape index: {}]   ;;  %s540_s8 = inlined_call_operand.hbm [shape: f32[8,32], index: 8, kind: output, shape index: {}]  }
   0x1   :  { %14 = vsyncpa [#allocation6], 0 }
   0x2   :  { %15 = vsyncpa [#allocation9], 0  ;;  %s33_s29 = sshll.u32 %s533_s1, 4  ;;  %s34_s29 = int_to_ptr.hbm [resolvable:$true] %s33_s29 }
   0x3   :  { %16 = vsyncpa [#allocation4], 0  ;;  %s442_s30 = smov [#allocation5]   ;;  %s22_s12 = sshll.u32 %s532_s0, 4  ;;  %s23_s12 = int_to_ptr.hbm [resolvable:$true] %s22_s12 }
   0x4   :  { %s35_s9 = sshll.u32 %s442_s30, 4  ;;  %s443_s13 = smov [#allocation2]   ;;  %s36_s9 = int_to_ptr.vmem [resolvable:$true] %s35_s9 }
   0x5   :  { %38 = dma.hbm_to_vmem [thread:$0]  %s34_s29, 128, %s36_s9, [#allocation6]  }
   0x6   :  { %s24_s14 = sshll.u32 %s443_s13, 4  ;;  %s43_s17 = sshll.u32 %s534_s2, 4  ;;  %s25_s14 = int_to_ptr.vmem [resolvable:$true] %s24_s14  ;;  %s44_s17 = int_to_ptr.hbm [resolvable:$true] %s43_s17 }
   0x7   :  { %27 = dma.hbm_to_vmem [thread:$0]  %s23_s12, 128, %s25_s14, [#allocation3]  }
   0x8   :  { %s444_s1 = smov [#allocation7]   ;;  %s58_s21 = sshll.u32 %s536_s4, 4  ;;  %s59_s21 = int_to_ptr.hbm [resolvable:$true] %s58_s21 }
   0x9   :  { %s45_s18 = sshll.u32 %s444_s1, 4  ;;  %s445_s22 = smov 64   ;;  %s46_s18 = int_to_ptr.vmem [resolvable:$true] %s45_s18 }
   0xa   :  { %s446_s0 = smov 4   ;;  %s447_s23 = smov [#allocation8]  }
   0xb   :  { %51 = dma.hbm_to_vmem [thread:$0]  %s44_s17, 128, %s46_s18, [#allocation6], %s445_s22, %s445_s22, %s446_s0  }
   0xc   :  { %s60_s24 = sshll.u32 %s447_s23, 4  ;;  %s61_s24 = int_to_ptr.vmem [resolvable:$true] %s60_s24 }
   0xd   :  { %66 = dma.hbm_to_vmem [thread:$0]  %s59_s21, 256, %s61_s24, [#allocation9], %s445_s22, %s445_s22, %s446_s0  }
   0xe   :  { %434 = dma.done.wait [#allocation3], 128  }
   0xf   :  { %435 = vsyncadd [#allocation3], 4294967168 }
  0x10   :  { %436 = dma.done.wait [#allocation6], 256  }
  0x11   :  { %437 = vsyncadd [#allocation6], 4294967040 }
  0x12   :  { %438 = dma.done.wait [#allocation9], 256  }
  0x13   :  { %439 = vsyncadd [#allocation9], 4294967040  ;;  %v285_v0 = vld [vmem:[#allocation8 + $0x8] sm:$0xff]  ;;  %v284_v1 = vld [vmem:[#allocation8] sm:$0xff]  ;;  %vm132_vm0 = vcmask 130048   ;;  %vm162_vm1 = vcmask 261120  }
  0x14   :  { %v283_v2 = vld [vmem:[#allocation7] sm:$0xff]  ;;  %v111_v3 = vld [vmem:[#allocation2] sm:$0xff]  ;;  %172 = vmatpush.bf16.msra.mxu1 %v285_v0  ;;  %v508_v4 = vld [vmem:[#allocation5] sm:$0xff]  ;;  %s448_s2 = smov 96   ;;  %v449_v53 = vmov 32.0   ;;  %s450_s30 = smov [#allocation10]  }
  0x15   :  { %v122_v5 = vpack.c.bf16 %v111_v3, %v111_v3  ;;  %143 = vmatpush.bf16.msra.mxu0 %v283_v2  ;;  %v149_v6 = vpack.c.bf16 %v508_v4, %v508_v4  ;;  %v90_v12 = vld [vmem:[%s537_s5] sm:$0x1]  ;;  %v204_v42 = vsub.f32 0.0, %v508_v4  ;;  %s254_s9 = sshll.u32 %s450_s30, 4  ;;  %s256_s12 = sshll.u32 %s540_s8, 4  ;;  %s255_s9 = int_to_ptr.vmem [resolvable:$true] %s254_s9  ;;  %s257_s12 = int_to_ptr.hbm [resolvable:$true] %s256_s12 }
  0x16   :  { %v94_v13 = vand.u32 2147483647, %v90_v12  ;;  %v91_v28 = vmax.f32 %v90_v12, 0.0  ;;  %vm92_vm3 = vcmp.ne.f32.partialorder %v90_v12, %v90_v12  ;;  %v295_v39 = vld [vmem:[%s535_s3] ss:$0 sm:$0xff] }
  0x18   :  { %173 = vmatpush.bf16.msra.mxu1 %v284_v1  ;;  %272 = vmatmul.msk.bf16.vlgmr.msra.gmra.mxu0 %vm132_vm0, %v122_v5  ;;  %v95_v14 = vsub.f32 0.0, %v94_v13  ;;  %v297_v13 = vld [vmem:[%s539_s7] ss:$0 sm:$0xff] }
  0x1a   :  { %v96_v15 = vmul.f32 1.442695, %v95_v14 }
  0x1b   :  { %281 = vmatmul.msk.bf16.vlgmr.msra.gmra.mxu1 %vm162_vm1, %v149_v6 }
  0x95   :  { %v145_v7 = vpop.f32.mrf.mxu0 }
  0x96   :  { %v146_v46 = vadd.f32 %v295_v39, %v145_v7 }
  0x98   :  { %v175_v8 = vpop.f32.mrf.mxu1 }
  0x99   :  { %298 = vtanh.f32 %v175_v8  ;;  %v282_v16 = vmul.f32 -1.442695, %v175_v8 }
  0x9a   :  { %300 = vpow2.f32 %v96_v15 }
  0x9b   :  { %302 = vpow2.f32 %v282_v16 }
  0x9d   :  { %v147_v9 = vpop.f32.mrf.mxu0 }
  0x9f   :  { %v299_v10 = vpop.eup %298 }
  0xa0   :  { %200 = vrot.lane.b32.xlu0 %v299_v10, %s448_s2  ;;  %v177_v11 = vpop.f32.mrf.mxu1  ;;  %v301_v17 = vpop.eup %300  ;;  %v296_v10 = vld [vmem:[%s538_s6] ss:$0 sm:$0xff] }
  0xa1   :  { %v98_v18 = vadd.f32 1.0, %v301_v17  ;;  %v303_v19 = vpop.eup %302  ;;  %v101_v21 = vmul.f32 -0.5, %v301_v17  ;;  %v104_v24 = vand.u32 2147483647, %v301_v17 }
  0xa2   :  { %v182_v20 = vadd.f32 1.0, %v303_v19 }
  0xa3   :  { %304 = vlog2.f32 %v98_v18  ;;  %v102_v22 = vadd.f32 1.0, %v101_v21  ;;  %vm105_vm2 = vcmp.lt.f32.partialorder %v104_v24, 0.0004427343 }
  0xa4   :  { %306 = vrcp.f32 %v182_v20  ;;  %v194_v37 = vand.u32 2147483648, %v182_v20  ;;  %vm188_vm5 = vweird.f32 %v182_v20  ;;  %v192_v38 = vand.u32 2147483647, %v182_v20 }
  0xa5   :  { %v103_v26 = vmul.f32 %v301_v17, %v102_v22 }
  0xa6   :  { %v195_v41 = vor.u32 1.1754944e-38, %v194_v37  ;;  %vm193_vm7 = vcmp.eq.f32.partialorder %v192_v38, 8.507059e+37 }
  0xa9   :  { %v305_v23 = vpop.eup %304 }
  0xaa   :  { %v100_v25 = vmul.f32 0.6931472, %v305_v23  ;;  %v307_v27 = vpop.eup %306 }
  0xab   :  { %v184_v30 = vmul.f32 %v307_v27, %v182_v20  ;;  %vm189_vm4 = vweird.f32 %v307_v27 }
  0xac   :  { %v106_v29 = vsel %vm105_vm2, %v103_v26, %v100_v25  ;;  %vm190_vm6 = vmor %vm188_vm5, %vm189_vm4 }
  0xad   :  { %v107_v31 = vadd.f32 %v106_v29, %v91_v28  ;;  %v185_v32 = vsub.f32 1.0, %v184_v30 }
  0xaf   :  { %v108_v33 = vsel %vm92_vm3, %v90_v12, %v107_v31  ;;  %v186_v34 = vmul.f32 %v307_v27, %v185_v32 }
  0xb0   :  { %v109_v35 = vadd.f32 0.1, %v108_v33 }
  0xb1   :  { %v187_v36 = vadd.f32 %v307_v27, %v186_v34 }
  0xb2   :  { %308 = vrcp.f32 %v109_v35 }
  0xb3   :  { %v191_v40 = vsel %vm190_vm6, %v307_v27, %v187_v36  ;;  %310 = vrcp.f32 %v449_v53 }
  0xb4   :  { %v196_v45 = vsel %vm193_vm7, %v195_v41, %v191_v40 }
  0xb8   :  { %v309_v43 = vpop.eup %308 }
  0xb9   :  { %v208_v49 = vperm.slane %v309_v43, 0  ;;  %v311_v54 = vpop.eup %310 }
  0xba   :  { %v215_v55 = vmul.f32 32.0, %v311_v54  ;;  %vm219_vm8 = vweird.f32 %v311_v54 }
  0xbc   :  { %v216_v56 = vsub.f32 1.0, %v215_v55 }
  0xbe   :  { %v217_v57 = vmul.f32 %v311_v54, %v216_v56 }
  0xc0   :  { %v218_v58 = vadd.f32 %v311_v54, %v217_v57 }
  0xc2   :  { %v220_v59 = vsel %vm219_vm8, %v311_v54, %v218_v58 }
 0x112   :  { %v201_v44 = vpop.permute.xlu0 %200 }
 0x113   :  { %v203_v47 = vmul.f32 %v201_v44, %v196_v45 }
 0x115   :  { %v205_v48 = vadd.f32 %v204_v42, %v203_v47 }
 0x117   :  { %v206_v50 = vadd.f32 %v205_v48, %v146_v46 }
 0x119   :  { %v210_v51 = vmul.f32 %v208_v49, %v206_v50 }
 0x11b   :  { %v211_v52 = vsel %vm162_vm1, %v210_v51, 0.0 }
 0x11c   :  { %212 = vadd.xlane.f32.xlu0 %v211_v52 }
 0x18f   :  { %v213_v60 = vpop.xlane.xlu0 %212 }
 0x190   :  { %v221_v61 = vmul.f32 %v220_v59, %v213_v60 }
 0x192   :  { %v222_v62 = vsub.f32 %v210_v51, %v221_v61 }
 0x194   :  { %v223_v63 = vmul.f32 %v222_v62, %v222_v62 }
 0x196   :  { %v224_v0 = vsel %vm162_vm1, %v223_v63, 0.0 }
 0x197   :  { %225 = vadd.xlane.f32.xlu1 %v224_v0 }
 0x20a   :  { %v226_v1 = vpop.xlane.xlu1 %225 }
 0x20b   :  { %v227_v2 = vmul.f32 %v226_v1, %v220_v59 }
 0x20d   :  { %v228_v3 = vadd.f32 1e-05, %v227_v2 }
 0x20f   :  { %312 = vrsqrt.f32 %v228_v3  ;;  %vm235_vm10 = vweird.f32 %v228_v3 }
 0x215   :  { %v313_v4 = vpop.eup %312 }
 0x216   :  { %v230_v5 = vmul.f32 %v313_v4, %v228_v3  ;;  %vm236_vm9 = vweird.f32 %v313_v4 }
 0x217   :  { %vm237_vm11 = vmor %vm235_vm10, %vm236_vm9 }
 0x218   :  { %v231_v6 = vmul.f32 %v313_v4, %v230_v5 }
 0x21a   :  { %v232_v7 = vmul.f32 0.5, %v231_v6 }
 0x21c   :  { %v233_v8 = vsub.f32 1.5, %v232_v7 }
 0x21e   :  { %v234_v9 = vmul.f32 %v313_v4, %v233_v8 }
 0x220   :  { %v238_v11 = vsel %vm237_vm11, %v313_v4, %v234_v9 }
 0x221   :  { %v239_v12 = vmul.f32 %v238_v11, %v222_v62 }
 0x223   :  { %v243_v14 = vmul.f32 %v296_v10, %v239_v12 }
 0x225   :  { %v247_v15 = vadd.f32 %v297_v13, %v243_v14 }
 0x227   :  { %248 = vst.msk [vmem:[#allocation10] sm:$0xff] %vm162_vm1, %v247_v15 }
 0x228   :  { %259 = dma.vmem_to_hbm [thread:$0]  %s255_s9, 128, %s257_s12, [#allocation4]  }
 0x229   :  { %440 = dma.done.wait [#allocation4], 128  }
 0x22a   :  { %441 = vsyncadd [#allocation4], 4294967168 }
 0x22b   :  { %264 = vsyncpa [#allocation3], 1 }
 0x22c   :  { %265 = vsyncpa [#allocation6], 1 }
 0x22d   :  { %266 = vsyncpa [#allocation9], 1 }
 0x22e   :  { %267 = vsyncpa [#allocation4], 1 }

</bundles_post_ra>
